<compile_context>
chip_gen: v7x
topology: tpu7x:2x2x1
jax: 0.10.0
libtpu: 0.0.40
codegen_flags: <defaults>
</compile_context>

<pallas_src>
import jax
import jax.numpy as jnp
from jax.experimental import pallas as pl
from jax.experimental.pallas import tpu as pltpu


def _mul_kernel(x_ref, w_ref, o_ref):
    # Elementwise hot path on the VPU; casts (if any) happen in-kernel so the
    # HBM->VMEM DMA moves the narrow original dtypes.
    o_ref[...] = x_ref[...].astype(o_ref.dtype) * w_ref[...].astype(o_ref.dtype)


def _round_up(a: int, b: int) -> int:
    return ((a + b - 1) // b) * b


def _sublane(dtype) -> int:
    # Packed-tile sublane multiple: f32 -> 8, bf16/f16 -> 16, int8/fp8 -> 32.
    return max(8, 32 // max(1, jnp.dtype(dtype).itemsize))


def mymodule_forward(
    x: jax.Array,
    weight: jax.Array,
    *,
    lanes: int = 512,              # preferred lane-dense last dim (multiple of 128)
    target_tile_rows: int = 2048,  # 2048 x 512 x 4B = 4 MiB block at f32
    donate_input: bool = False,    # alias x -> out when the caller can donate x
    vmem_limit_bytes: int = 40 << 20,
) -> jax.Array:
    """Equivalent of MyModule(weight)(x): elementwise x * weight."""
    assert x.shape == weight.shape, "weight is stored with the same shape as input"
    assert lanes % 128 == 0
    out_dtype = jnp.result_type(x.dtype, weight.dtype)
    orig_shape = x.shape
    n = x.size

    # --- Flatten into a lane-dense 2-D slab, zero-copy whenever possible. ---
    chosen_lanes = next((c for c in (lanes, 256, 128) if n % c == 0), None)
    if chosen_lanes is not None:
        xf, wf = x.reshape(-1), weight.reshape(-1)
        padded_n, need_slice = n, False
    else:
        # Rare fallback: pad the flat arrays by at most 127 elements so the
        # last dim is a full 128-lane multiple; slice the output back at the end.
        chosen_lanes = 128
        padded_n = _round_up(n, chosen_lanes)
        pad = padded_n - n
        xf = jnp.pad(x.reshape(-1), (0, pad))
        wf = jnp.pad(weight.reshape(-1), (0, pad))
        need_slice = True

    rows = padded_n // chosen_lanes
    x2 = xf.reshape(rows, chosen_lanes)
    w2 = wf.reshape(rows, chosen_lanes)

    # Dtype-aware sublane multiple (largest requirement across all operands).
    sub = max(_sublane(x.dtype), _sublane(weight.dtype), _sublane(out_dtype))

    if rows <= sub:
        # Tiny problem: a single block equal to the full array (always legal).
        tile_rows = rows
    else:
        # Keep ~constant block bytes if lanes shrank, cap so there are >=2
        # blocks (megacore), and round rows to the sublane multiple.  The
        # ragged last block is masked by Pallas (safe for multiply).
        scaled_target = _round_up(max(sub, target_tile_rows * 512 // chosen_lanes), sub)
        tile_rows = min(scaled_target, _round_up(pl.cdiv(rows, 2), sub))
    grid = (pl.cdiv(rows, tile_rows),)

    bytes_accessed = n * (
        jnp.dtype(x.dtype).itemsize
        + jnp.dtype(weight.dtype).itemsize
        + jnp.dtype(out_dtype).itemsize
    )
    cost = pl.CostEstimate(flops=n, transcendentals=0, bytes_accessed=bytes_accessed)

    io_aliases = {0: 0} if (donate_input and jnp.dtype(x.dtype) == jnp.dtype(out_dtype)) else {}

    out2 = pl.pallas_call(
        _mul_kernel,
        out_shape=jax.ShapeDtypeStruct((rows, chosen_lanes), out_dtype),
        grid=grid,
        in_specs=[
            pl.BlockSpec((tile_rows, chosen_lanes), lambda i: (i, 0)),
            pl.BlockSpec((tile_rows, chosen_lanes), lambda i: (i, 0)),
        ],
        out_specs=pl.BlockSpec((tile_rows, chosen_lanes), lambda i: (i, 0)),
        compiler_params=pltpu.CompilerParams(
            dimension_semantics=("parallel",),
            vmem_limit_bytes=vmem_limit_bytes,
        ),
        cost_estimate=cost,
        input_output_aliases=io_aliases,
    )(x2, w2)

    if need_slice:
        return out2.reshape(-1)[:n].reshape(orig_shape)
    return out2.reshape(orig_shape)


if __name__ == "__main__":
    key = jax.random.PRNGKey(0)
    kx, kw, kx2, kw2, kx3, kw3 = jax.random.split(key, 6)

    # Primary check: small NCHW shape (batch=2, channels=4, spatial=16x16),
    # divisible path (zero-copy, no padding, no output slice).
    x = jax.random.normal(kx, (2, 4, 16, 16), dtype=jnp.float32)
    weight = jax.random.normal(kw, (2, 4, 16, 16), dtype=jnp.float32)
    out = mymodule_forward(x, weight)
    jax.block_until_ready(out)
    ref = x * weight
    assert out.shape == ref.shape and out.dtype == ref.dtype
    assert jnp.allclose(out, ref, atol=1e-6, rtol=1e-6)

    # Ragged / fallback path: size not a multiple of 128 (tiny pad + slice).
    x_odd = jax.random.normal(kx2, (3, 5, 7, 9), dtype=jnp.float32)
    w_odd = jax.random.normal(kw2, (3, 5, 7, 9), dtype=jnp.float32)
    out_odd = mymodule_forward(x_odd, w_odd)
    jax.block_until_ready(out_odd)
    assert jnp.allclose(out_odd, x_odd * w_odd, atol=1e-6, rtol=1e-6)

    # Multi-block ragged grid path (128 lanes divide, rows not tile-aligned).
    x_mid = jax.random.normal(kx3, (4, 3, 40, 100), dtype=jnp.float32)
    w_mid = jax.random.normal(kw3, (4, 3, 40, 100), dtype=jnp.float32)
    out_mid = mymodule_forward(x_mid, w_mid)
    jax.block_until_ready(out_mid)
    assert jnp.allclose(out_mid, x_mid * w_mid, atol=1e-6, rtol=1e-6)

    print("KERNEL_OK")
</pallas_src>

<mosaic_0001>
module attributes {stable_mosaic.version = 11 : i64} {
  func.func @_mul_kernel(%arg0: i32, %arg1: memref<4x512xf32, #tpu.memory_space<vmem>>, %arg2: memref<4x512xf32, #tpu.memory_space<vmem>>, %arg3: memref<4x512xf32, #tpu.memory_space<vmem>>) attributes {dimension_semantics = [#tpu.dimension_semantics<parallel>], iteration_bounds = array<i64: 1>, scalar_prefetch = 0 : i64, scratch_operands = 0 : i64, tpu.core_type = #tpu.core_type<tc>, window_params = [{transform_indices = @transform_0, window_bounds = array<i64: 4, 512>}, {transform_indices = @transform_1, window_bounds = array<i64: 4, 512>}, {transform_indices = @transform_2, window_bounds = array<i64: 4, 512>}]} {
    %c0 = arith.constant 0 : index
    %c0_0 = arith.constant 0 : index
    %0 = vector.load %arg1[%c0, %c0_0] : memref<4x512xf32, #tpu.memory_space<vmem>>, vector<4x512xf32>
    %c0_1 = arith.constant 0 : index
    %c0_2 = arith.constant 0 : index
    %1 = vector.load %arg2[%c0_1, %c0_2] : memref<4x512xf32, #tpu.memory_space<vmem>>, vector<4x512xf32>
    %2 = arith.mulf %0, %1 : vector<4x512xf32>
    %c0_3 = arith.constant 0 : index
    %c0_4 = arith.constant 0 : index
    %3 = vector.load %arg3[%c0_3, %c0_4] : memref<4x512xf32, #tpu.memory_space<vmem>>, vector<4x512xf32>
    tpu.vector_store %arg3[%c0_3, %c0_4], %2 {strides = array<i32>} : memref<4x512xf32, #tpu.memory_space<vmem>>, vector<4x512xf32>,
    return
  }
  func.func @transform_0(%arg0: i32) -> (i32, i32) {
    %c0_i32 = arith.constant 0 : i32
    %c0_i32_0 = arith.constant 0 : i32
    return %arg0, %c0_i32 : i32, i32
  }
  func.func @transform_1(%arg0: i32) -> (i32, i32) {
    %c0_i32 = arith.constant 0 : i32
    %c0_i32_0 = arith.constant 0 : i32
    return %arg0, %c0_i32 : i32, i32
  }
  func.func @transform_2(%arg0: i32) -> (i32, i32) {
    %c0_i32 = arith.constant 0 : i32
    %c0_i32_0 = arith.constant 0 : i32
    return %arg0, %c0_i32 : i32, i32
  }
}

</mosaic_0001>

<bundles_post_ra>
// kernel: tpu_custom_call.1
= control target key start
LH: loop header
LB: loop body
LE: loop exit
PB: predicated region body
PF: predicated region fallthrough
CT: control target
= control target key end

     0   :  { %7 = vsyncpa [#allocation3], 0  ;;  %s189_s0 = inlined_call_operand.hbm [shape: f32[4,512], index: 0, kind: input, shape index: {}]   ;;  %s190_s1 = inlined_call_operand.hbm [shape: f32[4,512], index: 1, kind: input, shape index: {}]   ;;  %s191_s2 = inlined_call_operand.hbm [shape: f32[4,512], index: 2, kind: output, shape index: {}]  }
   0x1   :  { %8 = vsyncpa [#allocation6], 0 }
   0x2   :  { %9 = vsyncpa [#allocation4], 0  ;;  %s135_s9 = smov [#allocation2]   ;;  %s136_s11 = smov [#allocation5]  }
   0x3   :  { %s16_s10 = sshll.u32 %s135_s9, 4  ;;  %s26_s12 = sshll.u32 %s136_s11, 4  ;;  %s17_s10 = int_to_ptr.vmem [resolvable:$true] %s16_s10  ;;  %s27_s12 = int_to_ptr.vmem [resolvable:$true] %s26_s12 }
   0x4   :  { %s63_s15 = scalar_lea.hbm %s189_s0, 256 }
   0x5   :  { %p64_p0 = scmp.ne.s32.totalorder %s189_s0, %s63_s15  ;;  %p67_p1 = scmp.lt.u32.totalorder %s63_s15, %s189_s0 }
   0x7   :  { %p69_p2 = pnand %p67_p1, %p64_p0 }
   0x9   :  { %72 = shalt.err (!%p69_p2)
}
   0xa   :  { %s73_s20 = scalar_lea.vmem %s17_s10, 256  ;;  %p78_p4 = scmp.lt.s32.totalorder %s17_s10, %s17_s10 }
   0xb   :  { %p74_p3 = scmp.ne.s32.totalorder %s17_s10, %s73_s20  ;;  %p79_p5 = scmp.lt.s32.totalorder %s73_s20, %s73_s20 }
   0xd   :  { %p80_p6 = por %p79_p5, %p78_p4 }
   0xf   :  { %p81_p7 = pnand %p80_p6, %p74_p3 }
  0x11   :  { %84 = shalt.err (!%p81_p7)
}
  0x12   :  { %19 = dma.hbm_to_vmem [thread:$0]  %s189_s0, 256, %s17_s10, [#allocation3]  }
  0x13   :  { %s85_s25 = scalar_lea.hbm %s190_s1, 256 }
  0x14   :  { %p86_p8 = scmp.ne.s32.totalorder %s190_s1, %s85_s25  ;;  %p89_p9 = scmp.lt.u32.totalorder %s85_s25, %s190_s1 }
  0x16   :  { %p91_p10 = pnand %p89_p9, %p86_p8 }
  0x18   :  { %94 = shalt.err (!%p91_p10)
}
  0x19   :  { %s95_s30 = scalar_lea.vmem %s27_s12, 256  ;;  %p100_p12 = scmp.lt.s32.totalorder %s27_s12, %s27_s12 }
  0x1a   :  { %p96_p11 = scmp.ne.s32.totalorder %s27_s12, %s95_s30  ;;  %p101_p13 = scmp.lt.s32.totalorder %s95_s30, %s95_s30 }
  0x1c   :  { %p102_p0 = por %p101_p13, %p100_p12 }
  0x1e   :  { %p103_p1 = pnand %p102_p0, %p96_p11 }
  0x20   :  { %106 = shalt.err (!%p103_p1)
}
  0x21   :  { %29 = dma.hbm_to_vmem [thread:$0]  %s190_s1, 256, %s27_s12, [#allocation6]  }
  0x22   :  { %129 = dma.done.wait [#allocation3], 256  }
  0x23   :  { %130 = vsyncadd [#allocation3], 4294967040 }
  0x24   :  { %131 = dma.done.wait [#allocation6], 256  }
  0x25   :  { %132 = vsyncadd [#allocation6], 4294967040  ;;  %s137_s4 = smov [#allocation7]   ;;  %v36_v0 = vld [vmem:[#allocation2] sm:$0xff]  ;;  %v38_v1 = vld [vmem:[#allocation5] sm:$0xff] }
  0x26   :  { %s50_s5 = sshll.u32 %s137_s4, 4  ;;  %v37_v2 = vld [vmem:[#allocation2 + $0x8] sm:$0xff]  ;;  %v40_v3 = vmul.f32 %v38_v1, %v36_v0  ;;  %v39_v4 = vld [vmem:[#allocation5 + $0x8] sm:$0xff]  ;;  %s51_s5 = int_to_ptr.vmem [resolvable:$true] %s50_s5 }
  0x27   :  { %v41_v5 = vmul.f32 %v39_v4, %v37_v2  ;;  %s107_s6 = scalar_lea.vmem %s51_s5, 256  ;;  %p112_p3 = scmp.lt.s32.totalorder %s51_s5, %s51_s5 }
  0x28   :  { %42 = vst [vmem:[#allocation7] sm:$0xff] %v40_v3  ;;  %p108_p2 = scmp.ne.s32.totalorder %s51_s5, %s107_s6  ;;  %p113_p4 = scmp.lt.s32.totalorder %s107_s6, %s107_s6 }
  0x29   :  { %43 = vst [vmem:[#allocation7 + $0x8] sm:$0xff] %v41_v5 }
  0x2a   :  { %p114_p5 = por %p113_p4, %p112_p3 }
  0x2c   :  { %p115_p6 = pnand %p114_p5, %p108_p2 }
  0x2e   :  { %118 = shalt.err (!%p115_p6)
}
  0x2f   :  { %s119_s8 = scalar_lea.hbm %s191_s2, 256 }
  0x30   :  { %p120_p7 = scmp.ne.s32.totalorder %s191_s2, %s119_s8  ;;  %p123_p8 = scmp.lt.u32.totalorder %s119_s8, %s191_s2 }
  0x32   :  { %p125_p9 = pnand %p123_p8, %p120_p7 }
  0x34   :  { %128 = shalt.err (!%p125_p9)
}
  0x35   :  { %53 = dma.vmem_to_hbm [thread:$0]  %s51_s5, 256, %s191_s2, [#allocation4]  }
  0x36   :  { %133 = dma.done.wait [#allocation4], 256  }
  0x37   :  { %134 = vsyncadd [#allocation4], 4294967040 }
  0x38   :  { %57 = vsyncpa [#allocation3], 1 }
  0x39   :  { %58 = vsyncpa [#allocation6], 1 }
  0x3a   :  { %59 = vsyncpa [#allocation4], 1 }

</bundles_post_ra>
